<compile_context>
chip_gen: v6e
topology: v6e:2x2x1
jax: 0.10.0
libtpu: 0.0.40
codegen_flags: <defaults>
</compile_context>

<pallas_src>
import functools

import jax
import jax.numpy as jnp
from jax import lax
from jax.experimental import pallas as pl
from jax.experimental.pallas import tpu as pltpu


def _round_up(x, m):
    return ((x + m - 1) // m) * m


def _cdiv(a, b):
    return -(-a // b)


def _diff_loss_kernel(x1_ref, x2_ref, out_ref, g1_acc, g2_acc, *,
                      n1, n2, rem1, rem2, n_steps, d_total, eps):
    """Accumulate the two (B,B) raw Gram matrices over feature tiles; finalize on the last step."""
    k = pl.program_id(0)

    @pl.when(k == 0)
    def _init():
        g1_acc[...] = jnp.zeros_like(g1_acc)
        g2_acc[...] = jnp.zeros_like(g2_acc)

    dims = (((1,), (1,)), ((), ()))   # contract the feature axis of both operands

    def _accumulate(x_ref, g_acc, n, rem):
        def body():
            x = x_ref[...]            # (B, tk), native dtype; MXU handles the cast
            if rem:
                # Ragged last tile: columns past `rem` delivered by the edge DMA
                # are undefined -> zero them before the contraction.
                limit = jnp.where(k == n - 1, rem, x.shape[1])
                valid = lax.broadcasted_iota(jnp.int32, x.shape, 1) < limit
                x = jnp.where(valid, x, jnp.zeros_like(x))
            g_acc[...] += lax.dot_general(x, x, dims,
                                          preferred_element_type=jnp.float32)
        if n == n_steps:              # this input is live on every grid step
            body()
        else:                         # shorter input: skip dead MXU work afterwards
            pl.when(k < n)(body)

    _accumulate(x1_ref, g1_acc, n1, rem1)
    _accumulate(x2_ref, g2_acc, n2, rem2)

    @pl.when(k == n_steps - 1)
    def _finalize():
        # NOTE: for very large B this materializes a few (B,B) f32 temporaries on
        # top of the two scratches; fine for typical batch sizes.
        g1 = g1_acc[...]              # raw Grams: g[i, j] = x_i . x_j
        g2 = g2_acc[...]
        b = g1.shape[0]
        row = lax.broadcasted_iota(jnp.int32, (b, b), 0)
        col = lax.broadcasted_iota(jnp.int32, (b, b), 1)
        diag = row == col
        d1m = jnp.where(diag, g1, 0.0)    # diagonal = squared row norms of input1
        d2m = jnp.where(diag, g2, 0.0)
        # Row norms as a column (B,1) and a row (1,B) without any transpose:
        # reduce the masked diagonal along each axis.
        inv1_col = 1.0 / (jnp.sqrt(jnp.sum(d1m, axis=1, keepdims=True)) + eps)
        inv1_row = 1.0 / (jnp.sqrt(jnp.sum(d1m, axis=0, keepdims=True)) + eps)
        inv2_col = 1.0 / (jnp.sqrt(jnp.sum(d2m, axis=1, keepdims=True)) + eps)
        inv2_row = 1.0 / (jnp.sqrt(jnp.sum(d2m, axis=0, keepdims=True)) + eps)
        # ||x1n^T @ x2n||_F^2 == sum(G1n * G2n) with Gin the normalized Grams.
        prod = (g1 * inv1_col * inv1_row) * (g2 * inv2_col * inv2_row)
        total = jnp.sum(jnp.sum(prod, axis=1, keepdims=True), axis=0, keepdims=True)
        out_ref[...] = total / jnp.float32(d_total)


def _tile_plan(d, tk_budget):
    """(tile_width, num_tiles, ragged_remainder) for one input's feature axis."""
    if _round_up(d, 128) <= tk_budget:
        return d, 1, 0                # single full-width block: no masking needed
    n = _cdiv(d, tk_budget)
    return tk_budget, n, d % tk_budget


def _index_map(n, n_steps):
    if n == n_steps:
        return lambda k: (0, k)
    if n == 1:
        return lambda k: (0, 0)
    # Clamp so the block index repeats once this input is exhausted: Pallas then
    # keeps the resident buffer instead of re-issuing the DMA.
    return lambda k: (0, jnp.minimum(k, n - 1))


def diff_loss(input1, input2, *, vmem_input_budget_bytes=8 << 20):
    """Pallas implementation of DiffLoss.forward(input1, input2) -> f32 scalar.

    Inputs are streamed in their native dtype (keep bf16 bf16; do not upcast in
    the caller).  No wrapper-side padding or copies are introduced.
    """
    b = input1.shape[0]
    x1 = input1.reshape(b, -1)
    x2 = input2.reshape(b, -1)
    d1, d2 = x1.shape[1], x2.shape[1]

    dtype_bytes = max(x1.dtype.itemsize, x2.dtype.itemsize)
    bp = _round_up(b, 8)              # sublane-padded rows of one VMEM tile

    # Feature-tile width from an explicit VMEM budget:
    #   2 inputs * 2 pipeline buffers * bp rows * tk lanes * dtype_bytes <= budget
    tk_budget = (vmem_input_budget_bytes // (2 * 2 * bp * dtype_bytes)) // 128 * 128
    tk_budget = max(tk_budget, 512)

    tk1, n1, rem1 = _tile_plan(d1, tk_budget)
    tk2, n2, rem2 = _tile_plan(d2, tk_budget)
    n_steps = max(n1, n2)

    # Explicit VMEM limit so the same code stays inside v5e (16 MiB scoped default),
    # v6e (32 MiB default / 128 MiB physical) and v7x (32 MiB / 64 MiB physical).
    vmem_needed = (2 * bp * (_round_up(tk1, 128) + _round_up(tk2, 128)) * dtype_bytes
                   + 2 * bp * _round_up(b, 128) * 4     # two (B,B) f32 Gram scratches
                   + (2 << 20))                         # headroom
    vmem_limit = int(min(max(vmem_needed, 32 << 20), 48 << 20))

    kernel = functools.partial(
        _diff_loss_kernel,
        n1=n1, n2=n2, rem1=rem1, rem2=rem2, n_steps=n_steps,
        d_total=d1 * d2, eps=1e-6)

    loss = pl.pallas_call(
        kernel,
        out_shape=jax.ShapeDtypeStruct((1, 1), jnp.float32),
        grid=(n_steps,),
        in_specs=[pl.BlockSpec((b, tk1), _index_map(n1, n_steps)),
                  pl.BlockSpec((b, tk2), _index_map(n2, n_steps))],
        out_specs=pl.BlockSpec((1, 1), lambda k: (0, 0)),
        scratch_shapes=[pltpu.VMEM((b, b), jnp.float32),
                        pltpu.VMEM((b, b), jnp.float32)],
        compiler_params=pltpu.CompilerParams(
            dimension_semantics=("arbitrary",),          # D is a reduction axis
            vmem_limit_bytes=vmem_limit),
    )(x1, x2)

    return loss[0, 0]


if __name__ == "__main__":
    key = jax.random.PRNGKey(0)
    k1, k2, k3, k4 = jax.random.split(key, 4)

    def reference(a, c):
        a = a.reshape(a.shape[0], -1).astype(jnp.float32)
        c = c.reshape(c.shape[0], -1).astype(jnp.float32)
        an = a / (jnp.linalg.norm(a, axis=1, keepdims=True) + 1e-6)
        cn = c / (jnp.linalg.norm(c, axis=1, keepdims=True) + 1e-6)
        return jnp.mean((an.T @ cn) ** 2)

    # Primary case: NCHW inputs, D = 4*16*16 = 1024 -> single grid step, no pipeline.
    input1 = jax.random.normal(k1, (2, 4, 16, 16), dtype=jnp.float32)
    input2 = jax.random.normal(k2, (2, 4, 16, 16), dtype=jnp.float32)
    out = jax.block_until_ready(diff_loss(input1, input2))
    ref = reference(input1, input2)
    assert jnp.allclose(out, ref, rtol=1e-4, atol=1e-9), (out, ref)

    # Secondary case: unequal, non-128-multiple feature dims with a tiny tile budget
    # to exercise the multi-step path (ragged-tile masking + short-input clamping).
    a = jax.random.normal(k3, (2, 4, 325), dtype=jnp.float32)    # D1 = 1300
    c = jax.random.normal(k4, (2, 7, 100), dtype=jnp.float32)    # D2 = 700
    out2 = jax.block_until_ready(diff_loss(a, c, vmem_input_budget_bytes=64 * 1024))
    ref2 = reference(a, c)
    assert jnp.allclose(out2, ref2, rtol=1e-3, atol=1e-7), (out2, ref2)

    print("KERNEL_OK")
</pallas_src>

<mosaic_0001>
module attributes {stable_mosaic.version = 11 : i64} {
  func.func @_diff_loss_kernel(%arg0: i32, %arg1: memref<2x1024xf32, #tpu.memory_space<vmem>>, %arg2: memref<2x1024xf32, #tpu.memory_space<vmem>>, %arg3: memref<1x1xf32, #tpu.memory_space<vmem>>, %arg4: memref<2x2xf32, #tpu.memory_space<vmem>>, %arg5: memref<2x2xf32, #tpu.memory_space<vmem>>) attributes {dimension_semantics = [#tpu.dimension_semantics<arbitrary>], iteration_bounds = array<i64: 1>, scalar_prefetch = 0 : i64, scratch_operands = 2 : i64, tpu.core_type = #tpu.core_type<tc>, window_params = [{transform_indices = @transform_0, window_bounds = array<i64: 2, 1024>}, {transform_indices = @transform_1, window_bounds = array<i64: 2, 1024>}, {pipeline_mode = #tpu.pipeline_mode<synchronous>, transform_indices = @transform_2, window_bounds = array<i64: 1, 1>}]} {
    %c0_i32 = arith.constant 0 : i32
    %0 = arith.cmpi eq, %arg0, %c0_i32 : i32
    %1 = arith.extui %0 : i1 to i32
    %c0_i32_0 = arith.constant 0 : i32
    %2 = arith.cmpi ne, %1, %c0_i32_0 : i32
    scf.if %2 {
      %cst_15 = arith.constant 0.000000e+00 : f32
      %16 = vector.broadcast %cst_15 : f32 to vector<2x2xf32>
      %c0_16 = arith.constant 0 : index
      %c0_17 = arith.constant 0 : index
      %17 = vector.load %arg4[%c0_16, %c0_17] : memref<2x2xf32, #tpu.memory_space<vmem>>, vector<2x2xf32>
      tpu.vector_store %arg4[%c0_16, %c0_17], %16 {strides = array<i32>} : memref<2x2xf32, #tpu.memory_space<vmem>>, vector<2x2xf32>,
      %cst_18 = arith.constant 0.000000e+00 : f32
      %18 = vector.broadcast %cst_18 : f32 to vector<2x2xf32>
      %c0_19 = arith.constant 0 : index
      %c0_20 = arith.constant 0 : index
      %19 = vector.load %arg5[%c0_19, %c0_20] : memref<2x2xf32, #tpu.memory_space<vmem>>, vector<2x2xf32>
      tpu.vector_store %arg5[%c0_19, %c0_20], %18 {strides = array<i32>} : memref<2x2xf32, #tpu.memory_space<vmem>>, vector<2x2xf32>,
    } else {
    }
    %c0 = arith.constant 0 : index
    %c0_1 = arith.constant 0 : index
    %3 = vector.load %arg1[%c0, %c0_1] : memref<2x1024xf32, #tpu.memory_space<vmem>>, vector<2x1024xf32>
    %c0_2 = arith.constant 0 : index
    %c0_3 = arith.constant 0 : index
    %4 = vector.load %arg4[%c0_2, %c0_3] : memref<2x2xf32, #tpu.memory_space<vmem>>, vector<2x2xf32>
    %cst = arith.constant dense<0.000000e+00> : vector<2x2xf32>
    %5 = tpu.matmul %3, %3, %cst {dimension_numbers = #tpu.dot_dimension_numbers<[1], [1], [0], [0], [0, 0, 1, 0], [], []>} : vector<2x1024xf32>, vector<2x1024xf32>, vector<2x2xf32> -> vector<2x2xf32>
    %6 = arith.addf %4, %5 : vector<2x2xf32>
    %c0_4 = arith.constant 0 : index
    %c0_5 = arith.constant 0 : index
    %7 = vector.load %arg4[%c0_4, %c0_5] : memref<2x2xf32, #tpu.memory_space<vmem>>, vector<2x2xf32>
    tpu.vector_store %arg4[%c0_4, %c0_5], %6 {strides = array<i32>} : memref<2x2xf32, #tpu.memory_space<vmem>>, vector<2x2xf32>,
    %c0_6 = arith.constant 0 : index
    %c0_7 = arith.constant 0 : index
    %8 = vector.load %arg2[%c0_6, %c0_7] : memref<2x1024xf32, #tpu.memory_space<vmem>>, vector<2x1024xf32>
    %c0_8 = arith.constant 0 : index
    %c0_9 = arith.constant 0 : index
    %9 = vector.load %arg5[%c0_8, %c0_9] : memref<2x2xf32, #tpu.memory_space<vmem>>, vector<2x2xf32>
    %cst_10 = arith.constant dense<0.000000e+00> : vector<2x2xf32>
    %10 = tpu.matmul %8, %8, %cst_10 {dimension_numbers = #tpu.dot_dimension_numbers<[1], [1], [0], [0], [0, 0, 1, 0], [], []>} : vector<2x1024xf32>, vector<2x1024xf32>, vector<2x2xf32> -> vector<2x2xf32>
    %11 = arith.addf %9, %10 : vector<2x2xf32>
    %c0_11 = arith.constant 0 : index
    %c0_12 = arith.constant 0 : index
    %12 = vector.load %arg5[%c0_11, %c0_12] : memref<2x2xf32, #tpu.memory_space<vmem>>, vector<2x2xf32>
    tpu.vector_store %arg5[%c0_11, %c0_12], %11 {strides = array<i32>} : memref<2x2xf32, #tpu.memory_space<vmem>>, vector<2x2xf32>,
    %c0_i32_13 = arith.constant 0 : i32
    %13 = arith.cmpi eq, %arg0, %c0_i32_13 : i32
    %14 = arith.extui %13 : i1 to i32
    %c0_i32_14 = arith.constant 0 : i32
    %15 = arith.cmpi ne, %14, %c0_i32_14 : i32
    scf.if %15 {
      %c0_15 = arith.constant 0 : index
      %c0_16 = arith.constant 0 : index
      %16 = vector.load %arg4[%c0_15, %c0_16] : memref<2x2xf32, #tpu.memory_space<vmem>>, vector<2x2xf32>
      %c0_17 = arith.constant 0 : index
      %c0_18 = arith.constant 0 : index
      %17 = vector.load %arg5[%c0_17, %c0_18] : memref<2x2xf32, #tpu.memory_space<vmem>>, vector<2x2xf32>
      %18 = tpu.iota {dimensions = array<i32: 0>} : vector<2x2xi32>
      %19 = tpu.iota {dimensions = array<i32: 1>} : vector<2x2xi32>
      %20 = arith.cmpi eq, %18, %19 : vector<2x2xi32>
      %cst_19 = arith.constant 0.000000e+00 : f32
      %21 = vector.broadcast %cst_19 : f32 to vector<2x2xf32>
      %22 = arith.select %20, %16, %21 : vector<2x2xi1>, vector<2x2xf32>
      %cst_20 = arith.constant 0.000000e+00 : f32
      %23 = vector.broadcast %cst_20 : f32 to vector<2x2xf32>
      %24 = arith.select %20, %17, %23 : vector<2x2xi1>, vector<2x2xf32>
      %cst_21 = arith.constant dense<0.000000e+00> : vector<2xf32>
      %25 = vector.multi_reduction <add>, %22, %cst_21 [1] : vector<2x2xf32> to vector<2xf32>
      %26 = vector.shape_cast %25 : vector<2xf32> to vector<2x1xf32>
      %27 = math.sqrt %26 : vector<2x1xf32>
      %cst_22 = arith.constant 9.99999997E-7 : f32
      %28 = vector.broadcast %cst_22 : f32 to vector<2x1xf32>
      %29 = arith.addf %27, %28 : vector<2x1xf32>
      %cst_23 = arith.constant 1.000000e+00 : f32
      %30 = vector.broadcast %cst_23 : f32 to vector<2x1xf32>
      %31 = arith.divf %30, %29 : vector<2x1xf32>
      %cst_24 = arith.constant dense<0.000000e+00> : vector<2xf32>
      %32 = vector.multi_reduction <add>, %22, %cst_24 [0] : vector<2x2xf32> to vector<2xf32>
      %33 = vector.shape_cast %32 : vector<2xf32> to vector<1x2xf32>
      %34 = math.sqrt %33 : vector<1x2xf32>
      %cst_25 = arith.constant 9.99999997E-7 : f32
      %35 = vector.broadcast %cst_25 : f32 to vector<1x2xf32>
      %36 = arith.addf %34, %35 : vector<1x2xf32>
      %cst_26 = arith.constant 1.000000e+00 : f32
      %37 = vector.broadcast %cst_26 : f32 to vector<1x2xf32>
      %38 = arith.divf %37, %36 : vector<1x2xf32>
      %cst_27 = arith.constant dense<0.000000e+00> : vector<2xf32>
      %39 = vector.multi_reduction <add>, %24, %cst_27 [1] : vector<2x2xf32> to vector<2xf32>
      %40 = vector.shape_cast %39 : vector<2xf32> to vector<2x1xf32>
      %41 = math.sqrt %40 : vector<2x1xf32>
      %cst_28 = arith.constant 9.99999997E-7 : f32
      %42 = vector.broadcast %cst_28 : f32 to vector<2x1xf32>
      %43 = arith.addf %41, %42 : vector<2x1xf32>
      %cst_29 = arith.constant 1.000000e+00 : f32
      %44 = vector.broadcast %cst_29 : f32 to vector<2x1xf32>
      %45 = arith.divf %44, %43 : vector<2x1xf32>
      %cst_30 = arith.constant dense<0.000000e+00> : vector<2xf32>
      %46 = vector.multi_reduction <add>, %24, %cst_30 [0] : vector<2x2xf32> to vector<2xf32>
      %47 = vector.shape_cast %46 : vector<2xf32> to vector<1x2xf32>
      %48 = math.sqrt %47 : vector<1x2xf32>
      %cst_31 = arith.constant 9.99999997E-7 : f32
      %49 = vector.broadcast %cst_31 : f32 to vector<1x2xf32>
      %50 = arith.addf %48, %49 : vector<1x2xf32>
      %cst_32 = arith.constant 1.000000e+00 : f32
      %51 = vector.broadcast %cst_32 : f32 to vector<1x2xf32>
      %52 = arith.divf %51, %50 : vector<1x2xf32>
      %53 = vector.broadcast %31 : vector<2x1xf32> to vector<2x2xf32>
      %54 = arith.mulf %16, %53 : vector<2x2xf32>
      %55 = vector.broadcast %38 : vector<1x2xf32> to vector<2x2xf32>
      %56 = arith.mulf %54, %55 : vector<2x2xf32>
      %57 = vector.broadcast %45 : vector<2x1xf32> to vector<2x2xf32>
      %58 = arith.mulf %17, %57 : vector<2x2xf32>
      %59 = vector.broadcast %52 : vector<1x2xf32> to vector<2x2xf32>
      %60 = arith.mulf %58, %59 : vector<2x2xf32>
      %61 = arith.mulf %56, %60 : vector<2x2xf32>
      %cst_33 = arith.constant dense<0.000000e+00> : vector<2xf32>
      %62 = vector.multi_reduction <add>, %61, %cst_33 [1] : vector<2x2xf32> to vector<2xf32>
      %63 = vector.shape_cast %62 : vector<2xf32> to vector<2x1xf32>
      %cst_34 = arith.constant dense<0.000000e+00> : vector<1xf32>
      %64 = vector.multi_reduction <add>, %63, %cst_34 [0] : vector<2x1xf32> to vector<1xf32>
      %65 = vector.shape_cast %64 : vector<1xf32> to vector<1x1xf32>
      %cst_35 = arith.constant 0x49800000 : f32
      %66 = vector.broadcast %cst_35 : f32 to vector<1x1xf32>
      %67 = arith.divf %65, %66 : vector<1x1xf32>
      %c0_36 = arith.constant 0 : index
      %c0_37 = arith.constant 0 : index
      %68 = vector.load %arg3[%c0_36, %c0_37] : memref<1x1xf32, #tpu.memory_space<vmem>>, vector<1x1xf32>
      tpu.vector_store %arg3[%c0_36, %c0_37], %67 {strides = array<i32>} : memref<1x1xf32, #tpu.memory_space<vmem>>, vector<1x1xf32>,
    } else {
    }
    return
  }
  func.func @transform_0(%arg0: i32) -> (i32, i32) {
    %c0_i32 = arith.constant 0 : i32
    %c0_i32_0 = arith.constant 0 : i32
    return %c0_i32, %arg0 : i32, i32
  }
  func.func @transform_1(%arg0: i32) -> (i32, i32) {
    %c0_i32 = arith.constant 0 : i32
    %c0_i32_0 = arith.constant 0 : i32
    return %c0_i32, %arg0 : i32, i32
  }
  func.func @transform_2(%arg0: i32) -> (i32, i32) {
    %c0_i32 = arith.constant 0 : i32
    %c0_i32_0 = arith.constant 0 : i32
    %c0_i32_1 = arith.constant 0 : i32
    return %c0_i32, %c0_i32_0 : i32, i32
  }
}

</mosaic_0001>

<bundles_post_ra>
// kernel: tpu_custom_call.1
= control target key start
LH: loop header
LB: loop body
LE: loop exit
PB: predicated region body
PF: predicated region fallthrough
CT: control target
= control target key end

     0   :  { %7 = vsyncpa [#allocation5], 0  ;;  %s945_s0 = inlined_call_operand.hbm [shape: f32[2,1024], index: 0, kind: input, shape index: {}]   ;;  %s946_s1 = inlined_call_operand.hbm [shape: f32[2,1024], index: 1, kind: input, shape index: {}]   ;;  %s947_s2 = inlined_call_operand.hbm [shape: f32[1,1], index: 2, kind: output, shape index: {}]  }
   0x1   :  { %8 = vsyncpa [#allocation8], 0 }
   0x2   :  { %9 = vsyncpa [#allocation6], 0  ;;  %s899_s9 = smov [#allocation4]   ;;  %s900_s11 = smov [#allocation7]  }
   0x3   :  { %s16_s10 = sshll.u32 %s899_s9, 4  ;;  %s26_s12 = sshll.u32 %s900_s11, 4  ;;  %s17_s10 = int_to_ptr.vmem [resolvable:$true] %s16_s10  ;;  %s27_s12 = int_to_ptr.vmem [resolvable:$true] %s26_s12 }
   0x4   :  { %s841_s13 = scalar_lea.vmem %s17_s10, 256  ;;  %p846_p1 = scmp.lt.s32.totalorder %s17_s10, %s17_s10 }
   0x5   :  { %p842_p0 = scmp.ne.s32.totalorder %s17_s10, %s841_s13  ;;  %p847_p2 = scmp.lt.s32.totalorder %s841_s13, %s841_s13 }
   0x7   :  { %p848_p3 = por %p847_p2, %p846_p1 }
   0x9   :  { %p849_p4 = pnand %p848_p3, %p842_p0 }
   0xb   :  { %852 = shalt.err (!%p849_p4)
}
   0xc   :  { %19 = dma.hbm_to_vmem [thread:$0]  %s945_s0, 256, %s17_s10, [#allocation5]  }
   0xd   :  { %s861_s16 = scalar_lea.vmem %s27_s12, 256  ;;  %p866_p6 = scmp.lt.s32.totalorder %s27_s12, %s27_s12 }
   0xe   :  { %p862_p5 = scmp.ne.s32.totalorder %s27_s12, %s861_s16  ;;  %p867_p7 = scmp.lt.s32.totalorder %s861_s16, %s861_s16 }
  0x10   :  { %p868_p8 = por %p867_p7, %p866_p6 }
  0x12   :  { %p869_p9 = pnand %p868_p8, %p862_p5 }
  0x14   :  { %872 = shalt.err (!%p869_p9)
}
  0x15   :  { %29 = dma.hbm_to_vmem [thread:$0]  %s946_s1, 256, %s27_s12, [#allocation8]  }
  0x16   :  { %893 = dma.done.wait [#allocation5], 256  }
  0x17   :  { %894 = vsyncadd [#allocation5], 4294967040 }
  0x18   :  { %895 = dma.done.wait [#allocation8], 256  }
  0x19   :  { %896 = vsyncadd [#allocation8], 4294967040  ;;  %v52_v0 = vlaneseq  ;;  %v901_v1 = vmov 1983009808   ;;  %v43_v6 = vld [vmem:[#allocation4] sm:$0xff]  ;;  %v44_v7 = vld [vmem:[#allocation4 + $0x8] sm:$0xff] }
  0x1a   :  { %v50_v2 = vunpack.c.l.s4 %v901_v1  ;;  %v373_v8 = vld [vmem:[#allocation7] sm:$0xff]  ;;  %v48_v10 = vcombine.high %v43_v6, %v43_v6  ;;  %v65_v12 = vcombine.high %v44_v7, %v44_v7  ;;  %v374_v13 = vld [vmem:[#allocation7 + $0x8] sm:$0xff]  ;;  %vm40_vm0 = vcmask 9216   ;;  %s903_s0 = smov [#allocation9]  }
  0x1b   :  { %v926_v3 = vshrl.u32 %v52_v0, 7  ;;  %v378_v15 = vcombine.high %v373_v8, %v373_v8  ;;  %v395_v20 = vcombine.high %v374_v13, %v374_v13  ;;  %v902_v30 = vmov 0.0   ;;  %s798_s1 = sshll.u32 %s903_s0, 4  ;;  %s799_s1 = int_to_ptr.vmem [resolvable:$true] %s798_s1 }
  0x1c   :  { %v51_v4 = vunpack.c.0.s8 %v50_v2  ;;  %41 = vst.msk [vmem:[#allocation2] sm:$0x3] %vm40_vm0, %v902_v30  ;;  %42 = vst.msk [vmem:[#allocation3] sm:$0x3] %vm40_vm0, %v902_v30  ;;  %v710_v50 = vand.u32 127, %v52_v0  ;;  %vm780_vm10 = vcmask 1041408   ;;  %p878_p11 = scmp.lt.s32.totalorder %s799_s1, %s799_s1 }
  0x1d   :  { %vm790_vm11 = vcmask 0   ;;  %s873_s19 = scalar_lea.vmem %s799_s1, 16  ;;  %s877_s20 = scalar_lea.vmem %s799_s1, 32 }
  0x1e   :  { %v54_v5 = vsub.s32 %v51_v4, %v926_v3  ;;  %vm711_vm1 = vcmp.eq.s32.totalorder %v926_v3, %v710_v50  ;;  %p874_p10 = scmp.ne.s32.totalorder %s799_s1, %s873_s19  ;;  %p879_p12 = scmp.lt.s32.totalorder %s877_s20, %s873_s19 }
  0x20   :  { %v55_v9 = vrot.slane %v43_v6, %v54_v5  ;;  %v72_v11 = vrot.slane %v44_v7, %v54_v5  ;;  %v385_v14 = vrot.slane %v373_v8, %v54_v5  ;;  %v62_v17 = vrot.slane %v48_v10, %v54_v5  ;;  %p880_p13 = por %p879_p12, %p878_p11 }
  0x21   :  { %v79_v19 = vrot.slane %v65_v12, %v54_v5  ;;  %v392_v23 = vrot.slane %v378_v15, %v54_v5  ;;  %v402_v25 = vrot.slane %v374_v13, %v54_v5  ;;  %v409_v27 = vrot.slane %v395_v20, %v54_v5 }
  0x22   :  { %v63_v16 = vcombine.high %v55_v9, %v55_v9  ;;  %v80_v18 = vcombine.high %v72_v11, %v72_v11  ;;  %v64_v21 = vcombine.high %v62_v17, %v62_v17  ;;  %v393_v24 = vcombine.high %v385_v14, %v385_v14  ;;  %p881_p0 = pnand %p880_p13, %p874_p10 }
  0x23   :  { %v81_v22 = vcombine.high %v79_v19, %v79_v19  ;;  %v394_v26 = vcombine.high %v392_v23, %v392_v23  ;;  %v410_v28 = vcombine.high %v402_v25, %v402_v25  ;;  %v411_v29 = vcombine.high %v409_v27, %v409_v27  ;;  %v45_v39 = vld [vmem:[#allocation2] sm:$0x3]  ;;  %v375_v53 = vld [vmem:[#allocation3] sm:$0x3] }
  0x24   :  { %120 = vmatprep.subr.mxu0 %v63_v16  ;;  %154 = vmatprep.mubr.f32.mxu0 %v63_v16 }
  0x25   :  { %121 = vmatpush1.xpose.msra.mxu0 %v55_v9  ;;  %190 = vmatprep.subr.mxu1 %v64_v21 }
  0x26   :  { %260 = vmatprep.subr.mxu0 %v80_v18  ;;  %191 = vmatpush1.xpose.msra.mxu1 %v62_v17 }
  0x27   :  { %224 = vmatprep.mubr.f32.mxu1 %v64_v21  ;;  %330 = vmatprep.subr.mxu1 %v81_v22 }
  0x28   :  { %155 = vmatmul.mubr.f32.vlgmr.msra.gmra.mxu0 %v55_v9 }
  0x29   :  { %261 = vmatpush1.xpose.msra.mxu0 %v72_v11  ;;  %294 = vmatprep.mubr.f32.mxu0 %v80_v18 }
  0x2a   :  { %225 = vmatmul.mubr.f32.vlgmr.msra.gmra.mxu1 %v62_v17  ;;  %450 = vmatprep.subr.mxu0 %v393_v24 }
  0x2b   :  { %331 = vmatpush1.xpose.msra.mxu1 %v79_v19  ;;  %364 = vmatprep.mubr.f32.mxu1 %v81_v22 }
  0x2c   :  { %295 = vmatmul.mubr.f32.vlgmr.msra.gmra.mxu0 %v72_v11  ;;  %520 = vmatprep.subr.mxu1 %v394_v26 }
  0x2d   :  { %451 = vmatpush1.xpose.msra.mxu0 %v385_v14  ;;  %484 = vmatprep.mubr.f32.mxu0 %v393_v24 }
  0x2e   :  { %365 = vmatmul.mubr.f32.vlgmr.msra.gmra.mxu1 %v79_v19  ;;  %590 = vmatprep.subr.mxu0 %v410_v28 }
  0x2f   :  { %521 = vmatpush1.xpose.msra.mxu1 %v392_v23  ;;  %554 = vmatprep.mubr.f32.mxu1 %v394_v26 }
  0x30   :  { %485 = vmatmul.mubr.f32.vlgmr.msra.gmra.mxu0 %v385_v14  ;;  %660 = vmatprep.subr.mxu1 %v411_v29 }
  0x31   :  { %591 = vmatpush1.xpose.msra.mxu0 %v402_v25  ;;  %624 = vmatprep.mubr.f32.mxu0 %v410_v28 }
  0x32   :  { %555 = vmatmul.mubr.f32.vlgmr.msra.gmra.mxu1 %v392_v23 }
  0x33   :  { %661 = vmatpush1.xpose.msra.mxu1 %v409_v27  ;;  %694 = vmatprep.mubr.f32.mxu1 %v411_v29 }
  0x34   :  { %625 = vmatmul.mubr.f32.vlgmr.msra.gmra.mxu0 %v402_v25 }
  0x36   :  { %695 = vmatmul.mubr.f32.vlgmr.msra.gmra.mxu1 %v409_v27 }
  0xe8   :  { %v156_v31 = vpop.f32.mrf.mxu0 }
  0xea   :  { %v158_v32 = vpop.f32.mrf.mxu0  ;;  %v226_v33 = vpop.f32.mrf.mxu1 }
  0xeb   :  { %v227_v34 = vadd.f32 %v226_v33, %v156_v31 }
  0xec   :  { %v228_v35 = vpop.f32.mrf.mxu1  ;;  %v296_v36 = vpop.f32.mrf.mxu0 }
  0xed   :  { %v297_v37 = vadd.f32 %v296_v36, %v227_v34 }
  0xee   :  { %v298_v38 = vpop.f32.mrf.mxu0  ;;  %v366_v40 = vpop.f32.mrf.mxu1 }
  0xef   :  { %v367_v41 = vadd.f32 %v366_v40, %v297_v37 }
  0xf0   :  { %v368_v42 = vpop.f32.mrf.mxu1  ;;  %v486_v43 = vpop.f32.mrf.mxu0 }
  0xf1   :  { %v370_v44 = vadd.f32 %v367_v41, %v45_v39 }
  0xf2   :  { %v488_v45 = vpop.f32.mrf.mxu0  ;;  %v556_v46 = vpop.f32.mrf.mxu1 }
  0xf3   :  { %372 = vst.msk [vmem:[#allocation2] sm:$0x3] %vm40_vm0, %v370_v44  ;;  %v557_v47 = vadd.f32 %v556_v46, %v486_v43 }
  0xf4   :  { %v558_v48 = vpop.f32.mrf.mxu1  ;;  %v626_v49 = vpop.f32.mrf.mxu0 }
  0xf5   :  { %v627_v51 = vadd.f32 %v626_v49, %v557_v47 }
  0xf6   :  { %v628_v52 = vpop.f32.mrf.mxu0  ;;  %v696_v54 = vpop.f32.mrf.mxu1 }
  0xf7   :  { %v697_v55 = vadd.f32 %v696_v54, %v627_v51 }
  0xf8   :  { %v698_v56 = vpop.f32.mrf.mxu1 }
  0xf9   :  { %v700_v57 = vadd.f32 %v697_v55, %v375_v53 }
  0xfa   :  { %v934_v58 = vld [vmem:[#allocation2] sm:$0x3] }
  0xfb   :  { %701 = vst.msk [vmem:[#allocation3] sm:$0x3] %vm40_vm0, %v700_v57  ;;  %v712_v59 = vsel %vm711_vm1, %v934_v58, 0.0 }
  0xfc   :  { %v714_v60 = vsel %vm40_vm0, %v712_v59, 0.0 }
  0xfd   :  { %715 = vadd.xlane.f32.xlu0 %v714_v60  ;;  %v727_v0 = vrot.slane %v714_v60, 4 }
  0xff   :  { %v728_v2 = vadd.f32 %v727_v0, %v714_v60 }
 0x101   :  { %v729_v3 = vrot.slane %v728_v2, 2 }
 0x102   :  { %v706_v61 = vld [vmem:[#allocation3] sm:$0x3] }
 0x103   :  { %v713_v62 = vsel %vm711_vm1, %v706_v61, 0.0  ;;  %v730_v6 = vadd.f32 %v729_v3, %v728_v2 }
 0x104   :  { %v743_v63 = vsel %vm40_vm0, %v713_v62, 0.0 }
 0x105   :  { %744 = vadd.xlane.f32.xlu0 %v743_v63  ;;  %v756_v1 = vrot.slane %v743_v63, 4  ;;  %v731_v8 = vrot.slane %v730_v6, 1 }
 0x107   :  { %v757_v4 = vadd.f32 %v756_v1, %v743_v63  ;;  %v732_v10 = vadd.f32 %v731_v8, %v730_v6 }
 0x109   :  { %v758_v5 = vrot.slane %v757_v4, 2  ;;  %817 = vrsqrt.f32 %v732_v10  ;;  %vm735_vm4 = vcmp.eq.f32.partialorder %v732_v10, inf  ;;  %v738_v25 = vand.u32 2147483648, %v732_v10 }
 0x10a   :  { %vm737_vm6 = vcmp.eq.f32.partialorder %v732_v10, 0.0 }
 0x10b   :  { %v759_v7 = vadd.f32 %v758_v5, %v757_v4 }
 0x10d   :  { %v760_v9 = vrot.slane %v759_v7, 1 }
 0x10f   :  { %v761_v11 = vadd.f32 %v760_v9, %v759_v7 }
 0x111   :  { %819 = vrsqrt.f32 %v761_v11  ;;  %vm764_vm5 = vcmp.eq.f32.partialorder %v761_v11, inf  ;;  %v767_v28 = vand.u32 2147483648, %v761_v11  ;;  %vm766_vm7 = vcmp.eq.f32.partialorder %v761_v11, 0.0 }
 0x116   :  { %v818_v14 = vpop.eup %817 }
 0x117   :  { %v734_v19 = vmul.f32 %v818_v14, %v732_v10 }
 0x119   :  { %v736_v23 = vsel %vm735_vm4, %v732_v10, %v734_v19 }
 0x11a   :  { %v739_v30 = vsel %vm737_vm6, %v738_v25, %v736_v23 }
 0x11b   :  { %v740_v35 = vadd.f32 1e-06, %v739_v30 }
 0x11e   :  { %v820_v15 = vpop.eup %819 }
 0x11f   :  { %v763_v21 = vmul.f32 %v820_v15, %v761_v11 }
 0x121   :  { %v765_v26 = vsel %vm764_vm5, %v761_v11, %v763_v21 }
 0x122   :  { %v768_v32 = vsel %vm766_vm7, %v767_v28, %v765_v26 }
 0x123   :  { %v769_v37 = vadd.f32 1e-06, %v768_v32 }
 0x186   :  { %v716_v12 = vpop.xlane.xlu0 %715 }
 0x187   :  { %821 = vrsqrt.f32 %v716_v12  ;;  %vm719_vm2 = vcmp.eq.f32.partialorder %v716_v12, inf  ;;  %v722_v18 = vand.u32 2147483648, %v716_v12  ;;  %vm721_vm3 = vcmp.eq.f32.partialorder %v716_v12, 0.0 }
 0x18e   :  { %v745_v13 = vpop.xlane.xlu0 %744 }
 0x18f   :  { %823 = vrsqrt.f32 %v745_v13  ;;  %vm748_vm8 = vcmp.eq.f32.partialorder %v745_v13, inf  ;;  %v751_v31 = vand.u32 2147483648, %v745_v13  ;;  %vm750_vm9 = vcmp.eq.f32.partialorder %v745_v13, 0.0 }
 0x194   :  { %v822_v16 = vpop.eup %821 }
 0x195   :  { %v718_v17 = vmul.f32 %v822_v16, %v716_v12 }
 0x197   :  { %v720_v20 = vsel %vm719_vm2, %v716_v12, %v718_v17 }
 0x198   :  { %v723_v22 = vsel %vm721_vm3, %v722_v18, %v720_v20 }
 0x199   :  { %v724_v24 = vadd.f32 1e-06, %v723_v22 }
 0x19b   :  { %825 = vrcp.f32 %v724_v24 }
 0x19c   :  { %v824_v27 = vpop.eup %823 }
 0x19d   :  { %v747_v29 = vmul.f32 %v824_v27, %v745_v13 }
 0x19f   :  { %v749_v33 = vsel %vm748_vm8, %v745_v13, %v747_v29 }
 0x1a0   :  { %v752_v34 = vsel %vm750_vm9, %v751_v31, %v749_v33 }
 0x1a1   :  { %v753_v36 = vadd.f32 1e-06, %v752_v34 }
 0x1a3   :  { %827 = vrcp.f32 %v753_v36 }
 0x1a4   :  { %829 = vrcp.f32 %v740_v35 }
 0x1a5   :  { %831 = vrcp.f32 %v769_v37 }
 0x1a8   :  { %v826_v38 = vpop.eup %825 }
 0x1a9   :  { %v772_v39 = vmul.f32 %v826_v38, %v934_v58 }
 0x1b0   :  { %v828_v40 = vpop.eup %827 }
 0x1b1   :  { %v830_v41 = vpop.eup %829  ;;  %v774_v42 = vmul.f32 %v828_v40, %v706_v61 }
 0x1b2   :  { %v832_v43 = vpop.eup %831  ;;  %v773_v44 = vmul.f32 %v830_v41, %v772_v39 }
 0x1b3   :  { %v775_v45 = vmul.f32 %v832_v43, %v774_v42 }
 0x1b5   :  { %v776_v46 = vmul.f32 %v775_v45, %v773_v44 }
 0x1b7   :  { %v777_v47 = vsel %vm40_vm0, %v776_v46, 0.0 }
 0x1b8   :  { %778 = vadd.xlane.f32.xlu1 %v777_v47 }
 0x241   :  { %v779_v48 = vpop.xlane.xlu1 %778 }
 0x242   :  { %v781_v49 = vsel %vm780_vm10, %v779_v48, 0.0 }
 0x243   :  { %v782_v50 = vrot.slane %v781_v49, 4 }
 0x245   :  { %v783_v51 = vadd.f32 %v782_v50, %v781_v49 }
 0x247   :  { %v784_v52 = vrot.slane %v783_v51, 2 }
 0x249   :  { %v785_v53 = vadd.f32 %v784_v52, %v783_v51 }
 0x24b   :  { %v786_v54 = vrot.slane %v785_v53, 1 }
 0x24d   :  { %v787_v55 = vadd.f32 %v786_v54, %v785_v53 }
 0x24f   :  { %v789_v56 = vmul.f32 9.536743e-07, %v787_v55 }
 0x251   :  { %791 = vst.msk [vmem:[#allocation9] sm:$0x1] %vm790_vm11, %v789_v56 }
 0x252   :  { %884 = shalt.err (!%p881_p0)
}
 0x253   :  { %801 = dma.vmem_to_hbm [thread:$0]  %s799_s1, 16, %s947_s2, [#allocation6]  }
 0x254   :  { %897 = dma.done.wait [#allocation6], 16  }
 0x255   :  { %898 = vsyncadd [#allocation6], 4294967280 }
 0x256   :  { %805 = vsyncpa [#allocation5], 1 }
 0x257   :  { %806 = vsyncpa [#allocation8], 1 }
 0x258   :  { %807 = vsyncpa [#allocation6], 1 }

</bundles_post_ra>
